<compile_context>
chip_gen: v7x
topology: tpu7x:2x2x1
jax: 0.10.0
libtpu: 0.0.40
codegen_flags: <defaults>
</compile_context>

<pallas_src>
import functools

import jax
import jax.numpy as jnp
from jax.experimental import pallas as pl
from jax.experimental.pallas import tpu as pltpu

LANES = 128        # vreg lane width
_TILE_ALIGN = 256  # MXU M-dim alignment (v6e/v7x 2x256; multiple of 128 for v5e)


# ----------------------------- Pallas kernel -------------------------------

def actor_critic_kernel(
    state_ref,                      # [TB, D]       (bf16 or f32)
    w1_ref, b1_ref,                 # [D, HP],  [1, HP]    (actor|critic concat)
    w2_ref, b2_ref,                 # [HP, HP], [1, HP]    (block-diagonal)
    w3_ref, b3_ref,                 # [HP, OUT_P], [1, OUT_P]
    out_ref,                        # [TB, OUT_P]  cols [0:A)=action, col A=value
    *, num_actions,
):
    w_dtype = w1_ref.dtype
    x = state_ref[...].astype(w_dtype)

    # Fused layer 1: both networks' first layers in one MXU matmul (f32 acc).
    h = jnp.tanh(
        jnp.dot(x, w1_ref[...], preferred_element_type=jnp.float32) + b1_ref[...]
    )
    # Fused layer 2: block-diagonal keeps actor/critic hidden states separate.
    h = jnp.tanh(
        jnp.dot(h.astype(w_dtype), w2_ref[...],
                preferred_element_type=jnp.float32) + b2_ref[...]
    )
    # Fused layer 3: actor head (tanh-squashed) + critic head (linear).
    z = jnp.dot(h.astype(w_dtype), w3_ref[...],
                preferred_element_type=jnp.float32) + b3_ref[...]

    col = jax.lax.broadcasted_iota(jnp.int32, z.shape, dimension=1)
    # tanh only on the action lanes; value lane (and zero padding) stays linear.
    out_ref[...] = jnp.where(col < num_actions, jnp.tanh(z), z).astype(out_ref.dtype)


# --------------------------- param packing ---------------------------------

def pack_actor_critic_params(p, dtype=jnp.bfloat16):
    """Concat / block-diag pack both MLPs into 3 lane-padded weight matrices."""
    D, H = p["aw1"].shape
    A = p["aw3"].shape[1]
    assert 2 * H <= LANES and A + 1 <= LANES
    HP = OUT_P = LANES
    f32 = jnp.float32

    w1 = (jnp.zeros((D, HP), f32)
          .at[:, :H].set(p["aw1"])
          .at[:, H:2 * H].set(p["cw1"]))
    b1 = (jnp.zeros((1, HP), f32)
          .at[:, :H].set(p["ab1"])
          .at[:, H:2 * H].set(p["cb1"]))

    w2 = (jnp.zeros((HP, HP), f32)
          .at[:H, :H].set(p["aw2"])
          .at[H:2 * H, H:2 * H].set(p["cw2"]))
    b2 = (jnp.zeros((1, HP), f32)
          .at[:, :H].set(p["ab2"])
          .at[:, H:2 * H].set(p["cb2"]))

    w3 = (jnp.zeros((HP, OUT_P), f32)
          .at[:H, :A].set(p["aw3"])
          .at[H:2 * H, A:A + 1].set(p["cw3"]))
    b3 = (jnp.zeros((1, OUT_P), f32)
          .at[:, :A].set(p["ab3"])
          .at[:, A:A + 1].set(p["cb3"]))

    # Weights in the MXU compute dtype (bf16 by default); biases stay f32.
    return (w1.astype(dtype), b1, w2.astype(dtype), b2, w3.astype(dtype), b3), A


# ------------------------- batch-tile selection -----------------------------

def _round_up(x, m):
    return ((x + m - 1) // m) * m


def _select_batch_tile(B, batch_tile):
    """Pick (batch tile, padded batch length).

    Large B: 256-aligned tiles (fills MXU M-dim), capped at <= B/2 so the
    "parallel" batch grid has >= 2 steps (v7x has 2 TensorCores).
    Small B: 16-aligned tiles (safe for bf16 sublane packing), still >= 2
    grid steps when the batch allows it; padding stays tiny.
    """
    batch_tile = max(16, batch_tile)
    if B >= 2 * _TILE_ALIGN:
        cap = (B // 2) // _TILE_ALIGN * _TILE_ALIGN
        tb = min(_round_up(batch_tile, _TILE_ALIGN), cap)
    elif B >= 32:
        tb = min(_round_up(batch_tile, 16), _round_up((B + 1) // 2, 16))
    else:
        tb = 16
    return tb, _round_up(B, tb)


# ------------------------------ wrapper ------------------------------------

def _make_weight_spec(shape, single_buffer):
    if single_buffer:
        # Constant index_map -> block never changes across the grid: one buffer.
        return pl.BlockSpec(shape, lambda i: (0, 0),
                            pipeline_mode=pl.Buffered(buffer_count=1))
    return pl.BlockSpec(shape, lambda i: (0, 0))


def _run_pallas(x, packed, *, tb, A, out_dtype, single_buffer_weights):
    w1, b1, w2, b2, w3, b3 = packed
    BP, D = x.shape
    HP = w1.shape[1]
    OUT_P = w3.shape[1]

    def ws(shape):
        return _make_weight_spec(shape, single_buffer_weights)

    call = pl.pallas_call(
        functools.partial(actor_critic_kernel, num_actions=A),
        grid=(BP // tb,),
        in_specs=[
            pl.BlockSpec((tb, D), lambda i: (i, 0)),   # state tile (pipelined)
            ws((D, HP)),  ws((1, HP)),
            ws((HP, HP)), ws((1, HP)),
            ws((HP, OUT_P)), ws((1, OUT_P)),
        ],
        out_specs=pl.BlockSpec((tb, OUT_P), lambda i: (i, 0)),
        out_shape=jax.ShapeDtypeStruct((BP, OUT_P), out_dtype),
        compiler_params=pltpu.CompilerParams(
            dimension_semantics=("parallel",)),
    )
    return call(x, w1, b1, w2, b2, w3, b3)


def actor_critic_forward(state, params, *, batch_tile=512, dtype=jnp.bfloat16):
    """Fused actor/critic forward pass.

    state : [B, D] float32
    params: dict of per-network weights (weights [in, out], biases [1, out])
    returns (action [B, A], value [B, 1]) in `dtype`
    """
    B, _ = state.shape
    packed, A = pack_actor_critic_params(params, dtype=dtype)

    tb, BP = _select_batch_tile(B, batch_tile)
    x = state.astype(dtype)
    if BP != B:
        x = jnp.pad(x, ((0, BP - B), (0, 0)))   # zero-pad rows; trimmed below

    try:
        out = _run_pallas(x, packed, tb=tb, A=A, out_dtype=dtype,
                          single_buffer_weights=True)
    except Exception:
        # Fallback if single-buffered (Buffered(1)) weight specs are rejected.
        out = _run_pallas(x, packed, tb=tb, A=A, out_dtype=dtype,
                          single_buffer_weights=False)

    action = out[:B, :A]
    value = out[:B, A:A + 1]
    return action, value


# ------------------------- reference (pure JAX) -----------------------------

def actor_critic_reference(state, p):
    h = jnp.tanh(state @ p["aw1"] + p["ab1"])
    h = jnp.tanh(h @ p["aw2"] + p["ab2"])
    action = jnp.tanh(h @ p["aw3"] + p["ab3"])

    v = jnp.tanh(state @ p["cw1"] + p["cb1"])
    v = jnp.tanh(v @ p["cw2"] + p["cb2"])
    value = v @ p["cw3"] + p["cb3"]
    return action, value


# ------------------------------- main ---------------------------------------

if __name__ == "__main__":
    # Deliberately non-multiple-of-8 batch to exercise the padding path.
    B, D, H, A = 70, 16, 32, 8   # batch, state_dim, hidden, action_dim

    key = jax.random.PRNGKey(0)
    keys = jax.random.split(key, 13)

    def init(k, shape, scale=0.1):
        return (scale * jax.random.normal(k, shape)).astype(jnp.float32)

    params = {
        # actor MLP: D -> H -> H -> A
        "aw1": init(keys[0], (D, H)), "ab1": init(keys[1], (1, H)),
        "aw2": init(keys[2], (H, H)), "ab2": init(keys[3], (1, H)),
        "aw3": init(keys[4], (H, A)), "ab3": init(keys[5], (1, A)),
        # critic MLP: D -> H -> H -> 1
        "cw1": init(keys[6], (D, H)), "cb1": init(keys[7], (1, H)),
        "cw2": init(keys[8], (H, H)), "cb2": init(keys[9], (1, H)),
        "cw3": init(keys[10], (H, 1)), "cb3": init(keys[11], (1, 1)),
    }

    state = jax.random.normal(keys[12], (B, D)).astype(jnp.float32)
    ref_action, ref_value = actor_critic_reference(state, params)

    # 1) Exact-math path (f32 weights / f32 I/O) -- tight tolerance.
    a32, v32 = actor_critic_forward(state, params, dtype=jnp.float32)
    a32 = jax.block_until_ready(a32)
    v32 = jax.block_until_ready(v32)
    assert a32.shape == (B, A) and v32.shape == (B, 1)
    assert jnp.allclose(a32, ref_action, atol=1e-5, rtol=1e-5)
    assert jnp.allclose(v32, ref_value, atol=1e-5, rtol=1e-5)

    # 2) Performance path (bf16 I/O + weights, f32 accumulation) -- bf16 tolerance.
    abf, vbf = actor_critic_forward(state, params)   # dtype=bf16 default
    abf = jax.block_until_ready(abf)
    vbf = jax.block_until_ready(vbf)
    assert abf.shape == (B, A) and vbf.shape == (B, 1)
    assert abf.dtype == jnp.bfloat16 and vbf.dtype == jnp.bfloat16
    assert jnp.allclose(abf.astype(jnp.float32), ref_action, atol=2e-2, rtol=2e-2)
    assert jnp.allclose(vbf.astype(jnp.float32), ref_value, atol=2e-2, rtol=2e-2)

    print("KERNEL_OK")
</pallas_src>

<mosaic_0001>
module attributes {stable_mosaic.version = 11 : i64} {
  func.func @actor_critic_kernel(%arg0: i32, %arg1: memref<48x16xf32, #tpu.memory_space<vmem>>, %arg2: memref<16x128xf32, #tpu.memory_space<vmem>>, %arg3: memref<1x128xf32, #tpu.memory_space<vmem>>, %arg4: memref<128x128xf32, #tpu.memory_space<vmem>>, %arg5: memref<1x128xf32, #tpu.memory_space<vmem>>, %arg6: memref<128x128xf32, #tpu.memory_space<vmem>>, %arg7: memref<1x128xf32, #tpu.memory_space<vmem>>, %arg8: memref<48x128xf32, #tpu.memory_space<vmem>>) attributes {dimension_semantics = [#tpu.dimension_semantics<parallel>], iteration_bounds = array<i64: 2>, scalar_prefetch = 0 : i64, scratch_operands = 0 : i64, tpu.core_type = #tpu.core_type<tc>, window_params = [{transform_indices = @transform_0, window_bounds = array<i64: 48, 16>}, {pipeline_mode = #tpu.pipeline_mode<synchronous>, transform_indices = @transform_1, window_bounds = array<i64: 16, 128>}, {pipeline_mode = #tpu.pipeline_mode<synchronous>, transform_indices = @transform_2, window_bounds = array<i64: 1, 128>}, {pipeline_mode = #tpu.pipeline_mode<synchronous>, transform_indices = @transform_3, window_bounds = array<i64: 128, 128>}, {pipeline_mode = #tpu.pipeline_mode<synchronous>, transform_indices = @transform_4, window_bounds = array<i64: 1, 128>}, {pipeline_mode = #tpu.pipeline_mode<synchronous>, transform_indices = @transform_5, window_bounds = array<i64: 128, 128>}, {pipeline_mode = #tpu.pipeline_mode<synchronous>, transform_indices = @transform_6, window_bounds = array<i64: 1, 128>}, {transform_indices = @transform_7, window_bounds = array<i64: 48, 128>}]} {
    %c0 = arith.constant 0 : index
    %c0_0 = arith.constant 0 : index
    %0 = vector.load %arg1[%c0, %c0_0] : memref<48x16xf32, #tpu.memory_space<vmem>>, vector<48x16xf32>
    %c0_1 = arith.constant 0 : index
    %c0_2 = arith.constant 0 : index
    %1 = vector.load %arg2[%c0_1, %c0_2] : memref<16x128xf32, #tpu.memory_space<vmem>>, vector<16x128xf32>
    %cst = arith.constant dense<0.000000e+00> : vector<48x128xf32>
    %2 = tpu.matmul %0, %1, %cst {dimension_numbers = #tpu.dot_dimension_numbers<[1], [0], [0], [1], [0, 0, 1, 1], [], []>} : vector<48x16xf32>, vector<16x128xf32>, vector<48x128xf32> -> vector<48x128xf32>
    %c0_3 = arith.constant 0 : index
    %c0_4 = arith.constant 0 : index
    %3 = vector.load %arg3[%c0_3, %c0_4] : memref<1x128xf32, #tpu.memory_space<vmem>>, vector<1x128xf32>
    %4 = vector.broadcast %3 : vector<1x128xf32> to vector<48x128xf32>
    %5 = arith.addf %2, %4 : vector<48x128xf32>
    %6 = math.tanh %5 : vector<48x128xf32>
    %c0_5 = arith.constant 0 : index
    %c0_6 = arith.constant 0 : index
    %7 = vector.load %arg4[%c0_5, %c0_6] : memref<128x128xf32, #tpu.memory_space<vmem>>, vector<128x128xf32>
    %cst_7 = arith.constant dense<0.000000e+00> : vector<48x128xf32>
    %8 = tpu.matmul %6, %7, %cst_7 {dimension_numbers = #tpu.dot_dimension_numbers<[1], [0], [0], [1], [0, 0, 1, 1], [], []>} : vector<48x128xf32>, vector<128x128xf32>, vector<48x128xf32> -> vector<48x128xf32>
    %c0_8 = arith.constant 0 : index
    %c0_9 = arith.constant 0 : index
    %9 = vector.load %arg5[%c0_8, %c0_9] : memref<1x128xf32, #tpu.memory_space<vmem>>, vector<1x128xf32>
    %10 = vector.broadcast %9 : vector<1x128xf32> to vector<48x128xf32>
    %11 = arith.addf %8, %10 : vector<48x128xf32>
    %12 = math.tanh %11 : vector<48x128xf32>
    %c0_10 = arith.constant 0 : index
    %c0_11 = arith.constant 0 : index
    %13 = vector.load %arg6[%c0_10, %c0_11] : memref<128x128xf32, #tpu.memory_space<vmem>>, vector<128x128xf32>
    %cst_12 = arith.constant dense<0.000000e+00> : vector<48x128xf32>
    %14 = tpu.matmul %12, %13, %cst_12 {dimension_numbers = #tpu.dot_dimension_numbers<[1], [0], [0], [1], [0, 0, 1, 1], [], []>} : vector<48x128xf32>, vector<128x128xf32>, vector<48x128xf32> -> vector<48x128xf32>
    %c0_13 = arith.constant 0 : index
    %c0_14 = arith.constant 0 : index
    %15 = vector.load %arg7[%c0_13, %c0_14] : memref<1x128xf32, #tpu.memory_space<vmem>>, vector<1x128xf32>
    %16 = vector.broadcast %15 : vector<1x128xf32> to vector<48x128xf32>
    %17 = arith.addf %14, %16 : vector<48x128xf32>
    %18 = tpu.iota {dimensions = array<i32: 1>} : vector<48x128xi32>
    %c8_i32 = arith.constant 8 : i32
    %19 = vector.broadcast %c8_i32 : i32 to vector<48x128xi32>
    %20 = arith.cmpi slt, %18, %19 : vector<48x128xi32>
    %21 = math.tanh %17 : vector<48x128xf32>
    %22 = arith.select %20, %21, %17 : vector<48x128xi1>, vector<48x128xf32>
    %c0_15 = arith.constant 0 : index
    %c0_16 = arith.constant 0 : index
    %23 = vector.load %arg8[%c0_15, %c0_16] : memref<48x128xf32, #tpu.memory_space<vmem>>, vector<48x128xf32>
    tpu.vector_store %arg8[%c0_15, %c0_16], %22 {strides = array<i32>} : memref<48x128xf32, #tpu.memory_space<vmem>>, vector<48x128xf32>,
    return
  }
  func.func @transform_0(%arg0: i32) -> (i32, i32) {
    %c0_i32 = arith.constant 0 : i32
    %c0_i32_0 = arith.constant 0 : i32
    return %arg0, %c0_i32 : i32, i32
  }
  func.func @transform_1(%arg0: i32) -> (i32, i32) {
    %c0_i32 = arith.constant 0 : i32
    %c0_i32_0 = arith.constant 0 : i32
    %c0_i32_1 = arith.constant 0 : i32
    return %c0_i32, %c0_i32_0 : i32, i32
  }
  func.func @transform_2(%arg0: i32) -> (i32, i32) {
    %c0_i32 = arith.constant 0 : i32
    %c0_i32_0 = arith.constant 0 : i32
    %c0_i32_1 = arith.constant 0 : i32
    return %c0_i32, %c0_i32_0 : i32, i32
  }
  func.func @transform_3(%arg0: i32) -> (i32, i32) {
    %c0_i32 = arith.constant 0 : i32
    %c0_i32_0 = arith.constant 0 : i32
    %c0_i32_1 = arith.constant 0 : i32
    return %c0_i32, %c0_i32_0 : i32, i32
  }
  func.func @transform_4(%arg0: i32) -> (i32, i32) {
    %c0_i32 = arith.constant 0 : i32
    %c0_i32_0 = arith.constant 0 : i32
    %c0_i32_1 = arith.constant 0 : i32
    return %c0_i32, %c0_i32_0 : i32, i32
  }
  func.func @transform_5(%arg0: i32) -> (i32, i32) {
    %c0_i32 = arith.constant 0 : i32
    %c0_i32_0 = arith.constant 0 : i32
    %c0_i32_1 = arith.constant 0 : i32
    return %c0_i32, %c0_i32_0 : i32, i32
  }
  func.func @transform_6(%arg0: i32) -> (i32, i32) {
    %c0_i32 = arith.constant 0 : i32
    %c0_i32_0 = arith.constant 0 : i32
    %c0_i32_1 = arith.constant 0 : i32
    return %c0_i32, %c0_i32_0 : i32, i32
  }
  func.func @transform_7(%arg0: i32) -> (i32, i32) {
    %c0_i32 = arith.constant 0 : i32
    %c0_i32_0 = arith.constant 0 : i32
    return %arg0, %c0_i32 : i32, i32
  }
}

module attributes {stable_mosaic.version = 11 : i64} {
  func.func @actor_critic_kernel(%arg0: i32, %arg1: memref<48x16xf32, #tpu.memory_space<vmem>>, %arg2: memref<16x128xf32, #tpu.memory_space<vmem>>, %arg3: memref<1x128xf32, #tpu.memory_space<vmem>>, %arg4: memref<128x128xf32, #tpu.memory_space<vmem>>, %arg5: memref<1x128xf32, #tpu.memory_space<vmem>>, %arg6: memref<128x128xf32, #tpu.memory_space<vmem>>, %arg7: memref<1x128xf32, #tpu.memory_space<vmem>>, %arg8: memref<48x128xf32, #tpu.memory_space<vmem>>) attributes {dimension_semantics = [#tpu.dimension_semantics<parallel>], iteration_bounds = array<i64: 2>, scalar_prefetch = 0 : i64, scratch_operands = 0 : i64, tpu.core_type = #tpu.core_type<tc>, window_params = [{transform_indices = @transform_0, window_bounds = array<i64: 48, 16>}, {pipeline_mode = #tpu.pipeline_mode<synchronous>, transform_indices = @transform_1, window_bounds = array<i64: 16, 128>}, {pipeline_mode = #tpu.pipeline_mode<synchronous>, transform_indices = @transform_2, window_bounds = array<i64: 1, 128>}, {pipeline_mode = #tpu.pipeline_mode<synchronous>, transform_indices = @transform_3, window_bounds = array<i64: 128, 128>}, {pipeline_mode = #tpu.pipeline_mode<synchronous>, transform_indices = @transform_4, window_bounds = array<i64: 1, 128>}, {pipeline_mode = #tpu.pipeline_mode<synchronous>, transform_indices = @transform_5, window_bounds = array<i64: 128, 128>}, {pipeline_mode = #tpu.pipeline_mode<synchronous>, transform_indices = @transform_6, window_bounds = array<i64: 1, 128>}, {transform_indices = @transform_7, window_bounds = array<i64: 48, 128>}]} {
    %c0 = arith.constant 0 : index
    %c0_0 = arith.constant 0 : index
    %0 = vector.load %arg1[%c0, %c0_0] : memref<48x16xf32, #tpu.memory_space<vmem>>, vector<48x16xf32>
    %c0_1 = arith.constant 0 : index
    %c0_2 = arith.constant 0 : index
    %1 = vector.load %arg2[%c0_1, %c0_2] : memref<16x128xf32, #tpu.memory_space<vmem>>, vector<16x128xf32>
    %cst = arith.constant dense<0.000000e+00> : vector<48x128xf32>
    %2 = tpu.matmul %0, %1, %cst {dimension_numbers = #tpu.dot_dimension_numbers<[1], [0], [0], [1], [0, 0, 1, 1], [], []>} : vector<48x16xf32>, vector<16x128xf32>, vector<48x128xf32> -> vector<48x128xf32>
    %c0_3 = arith.constant 0 : index
    %c0_4 = arith.constant 0 : index
    %3 = vector.load %arg3[%c0_3, %c0_4] : memref<1x128xf32, #tpu.memory_space<vmem>>, vector<1x128xf32>
    %4 = vector.broadcast %3 : vector<1x128xf32> to vector<48x128xf32>
    %5 = arith.addf %2, %4 : vector<48x128xf32>
    %6 = math.tanh %5 : vector<48x128xf32>
    %c0_5 = arith.constant 0 : index
    %c0_6 = arith.constant 0 : index
    %7 = vector.load %arg4[%c0_5, %c0_6] : memref<128x128xf32, #tpu.memory_space<vmem>>, vector<128x128xf32>
    %cst_7 = arith.constant dense<0.000000e+00> : vector<48x128xf32>
    %8 = tpu.matmul %6, %7, %cst_7 {dimension_numbers = #tpu.dot_dimension_numbers<[1], [0], [0], [1], [0, 0, 1, 1], [], []>} : vector<48x128xf32>, vector<128x128xf32>, vector<48x128xf32> -> vector<48x128xf32>
    %c0_8 = arith.constant 0 : index
    %c0_9 = arith.constant 0 : index
    %9 = vector.load %arg5[%c0_8, %c0_9] : memref<1x128xf32, #tpu.memory_space<vmem>>, vector<1x128xf32>
    %10 = vector.broadcast %9 : vector<1x128xf32> to vector<48x128xf32>
    %11 = arith.addf %8, %10 : vector<48x128xf32>
    %12 = math.tanh %11 : vector<48x128xf32>
    %c0_10 = arith.constant 0 : index
    %c0_11 = arith.constant 0 : index
    %13 = vector.load %arg6[%c0_10, %c0_11] : memref<128x128xf32, #tpu.memory_space<vmem>>, vector<128x128xf32>
    %cst_12 = arith.constant dense<0.000000e+00> : vector<48x128xf32>
    %14 = tpu.matmul %12, %13, %cst_12 {dimension_numbers = #tpu.dot_dimension_numbers<[1], [0], [0], [1], [0, 0, 1, 1], [], []>} : vector<48x128xf32>, vector<128x128xf32>, vector<48x128xf32> -> vector<48x128xf32>
    %c0_13 = arith.constant 0 : index
    %c0_14 = arith.constant 0 : index
    %15 = vector.load %arg7[%c0_13, %c0_14] : memref<1x128xf32, #tpu.memory_space<vmem>>, vector<1x128xf32>
    %16 = vector.broadcast %15 : vector<1x128xf32> to vector<48x128xf32>
    %17 = arith.addf %14, %16 : vector<48x128xf32>
    %18 = tpu.iota {dimensions = array<i32: 1>} : vector<48x128xi32>
    %c8_i32 = arith.constant 8 : i32
    %19 = vector.broadcast %c8_i32 : i32 to vector<48x128xi32>
    %20 = arith.cmpi slt, %18, %19 : vector<48x128xi32>
    %21 = math.tanh %17 : vector<48x128xf32>
    %22 = arith.select %20, %21, %17 : vector<48x128xi1>, vector<48x128xf32>
    %c0_15 = arith.constant 0 : index
    %c0_16 = arith.constant 0 : index
    %23 = vector.load %arg8[%c0_15, %c0_16] : memref<48x128xf32, #tpu.memory_space<vmem>>, vector<48x128xf32>
    tpu.vector_store %arg8[%c0_15, %c0_16], %22 {strides = array<i32>} : memref<48x128xf32, #tpu.memory_space<vmem>>, vector<48x128xf32>,
    return
  }
  func.func @transform_0(%arg0: i32) -> (i32, i32) {
    %c0_i32 = arith.constant 0 : i32
    %c0_i32_0 = arith.constant 0 : i32
    return %arg0, %c0_i32 : i32, i32
  }
  func.func @transform_1(%arg0: i32) -> (i32, i32) {
    %c0_i32 = arith.constant 0 : i32
    %c0_i32_0 = arith.constant 0 : i32
    %c0_i32_1 = arith.constant 0 : i32
    return %c0_i32, %c0_i32_0 : i32, i32
  }
  func.func @transform_2(%arg0: i32) -> (i32, i32) {
    %c0_i32 = arith.constant 0 : i32
    %c0_i32_0 = arith.constant 0 : i32
    %c0_i32_1 = arith.constant 0 : i32
    return %c0_i32, %c0_i32_0 : i32, i32
  }
  func.func @transform_3(%arg0: i32) -> (i32, i32) {
    %c0_i32 = arith.constant 0 : i32
    %c0_i32_0 = arith.constant 0 : i32
    %c0_i32_1 = arith.constant 0 : i32
    return %c0_i32, %c0_i32_0 : i32, i32
  }
  func.func @transform_4(%arg0: i32) -> (i32, i32) {
    %c0_i32 = arith.constant 0 : i32
    %c0_i32_0 = arith.constant 0 : i32
    %c0_i32_1 = arith.constant 0 : i32
    return %c0_i32, %c0_i32_0 : i32, i32
  }
  func.func @transform_5(%arg0: i32) -> (i32, i32) {
    %c0_i32 = arith.constant 0 : i32
    %c0_i32_0 = arith.constant 0 : i32
    %c0_i32_1 = arith.constant 0 : i32
    return %c0_i32, %c0_i32_0 : i32, i32
  }
  func.func @transform_6(%arg0: i32) -> (i32, i32) {
    %c0_i32 = arith.constant 0 : i32
    %c0_i32_0 = arith.constant 0 : i32
    %c0_i32_1 = arith.constant 0 : i32
    return %c0_i32, %c0_i32_0 : i32, i32
  }
  func.func @transform_7(%arg0: i32) -> (i32, i32) {
    %c0_i32 = arith.constant 0 : i32
    %c0_i32_0 = arith.constant 0 : i32
    return %arg0, %c0_i32 : i32, i32
  }
}

</mosaic_0001>

<bundles_post_ra>
// kernel: tpu_custom_call.1
= control target key start
LH: loop header
LB: loop body
LE: loop exit
PB: predicated region body
PF: predicated region fallthrough
CT: control target
= control target key end

     0   :  { %12 = vsyncpa [#allocation3], 0  ;;  %s1566_s0 = inlined_call_operand.vmem [shape: f32[96,16], index: 0, kind: input, shape index: {}]   ;;  %s1567_s1 = inlined_call_operand.hbm [shape: f32[16,128], index: 1, kind: input, shape index: {}]   ;;  %s1568_s2 = inlined_call_operand.vmem [shape: f32[1,128], index: 2, kind: input, shape index: {}]   ;;  %s1569_s3 = inlined_call_operand.hbm [shape: f32[128,128], index: 3, kind: input, shape index: {}]   ;;  %s1570_s4 = inlined_call_operand.vmem [shape: f32[1,128], index: 4, kind: input, shape index: {}]   ;;  %s1571_s5 = inlined_call_operand.vmem [shape: f32[128,128], index: 5, kind: input, shape index: {}]   ;;  %s1572_s6 = inlined_call_operand.vmem [shape: f32[1,128], index: 6, kind: input, shape index: {}]   ;;  %s1573_s7 = inlined_call_operand.hbm [shape: f32[96,128], index: 7, kind: output, shape index: {}]  }
   0x1   :  { %13 = vsyncpa [#allocation6], 0 }
   0x2   :  { %14 = vsyncpa [#allocation4], 0 }
   0x3   :  { %16 = vsyncpa [#allocation4 + $0x1], 0  ;;  %s1319_s24 = smov 0   ;;  %s1321_s25 = smov 0  }
   0x4   :  { %s1323_s26 = smov 0   ;;  %s1325_s27 = smov 0  }
   0x5 LB: > { %s1340_s28 = sadd.s32 4294967295, %s1270_s27   ;;  %s806_s29 = sadd.s32 4294967294, %s1270_s27   ;;  %s1270_s27 = sphi %s1325_s27, %s1593_s27   ;;  %s1266_s26 = sphi %s1323_s26, %s1592_s26   ;;  %s1262_s25 = sphi %s1321_s25, %s1591_s25   ;;  %s1258_s24 = sphi %s1319_s24, %s1590_s24  }
   0x6   : > { %s1344_s30 = sadd.s32 1, %s1270_s27   ;;  %s181_s8 = sadd.s32 1, %s1266_s26 }
   0x7   : > { %s178_s9 = ssub.s32 %s1270_s27, %s1344_s30  ;;  %p191_p0 = scmp.ne.s32.totalorder %s1266_s26, %s1262_s25 }
   0x8   : > { %p179_p1 = scmp.eq.s32.totalorder %s178_s9, 0  ;;  %p192_p2 = scmp.eq.s32.totalorder %s1340_s28, 1 }
   0x9   : > { %p197_p3 = scmp.ne.s32.totalorder %s1262_s25, %s1258_s24  ;;  %p198_p4 = scmp.eq.s32.totalorder %s806_s29, 1 }
   0xa   : > { %s1355_s10 = scalar_select %p179_p1, %s1266_s26, %s181_s8  }
   0xb   : > { %p1357_p5 = por %p192_p2, %p191_p0  ;;  %p1361_p6 = por %p198_p4, %p197_p3 }
   0xc   : > { %1577 = sst [smem:[#allocation11_spill]] %s1355_s10  ;;  %p807_p7 = scmp.ge.s32.totalorder %s1270_s27, 1 }
   0xd   : > { %s1578_s11 = scalar_select %p1357_p5, 1, 0 }
   0xe   : > { %s1579_s12 = scalar_select %p1361_p6, 1, 0 }
   0xf   : > { %p205_p8 = scmp.lt.s32.totalorder %s1270_s27, 3  ;;  %p1574_p9 = scmp.eq.s32.totalorder %s1340_s28, 0 }
  0x10   : > { %s1272_s14 = smov [#allocation2]   ;;  %s1273_s17 = smov [#allocation5]  }
  0x11   : > { %p1368_p10 = pnand %p807_p7, %p205_p8  ;;  %s217_s15 = sshll.u32 %s1272_s14, 4  ;;  %s218_s15 = int_to_ptr.vmem [resolvable:$true] %s217_s15 }
  0x12   : > { %s233_s18 = sshll.u32 %s1273_s17, 4  ;;  %s1144_s21 = scalar_lea.hbm %s1567_s1, 256  ;;  %s1380_s18 = int_to_ptr.vmem [resolvable:$true] %s233_s18 }
  0x13   : > { %s1580_s13 = scalar_select %p1368_p10, 1, 0 }
  0x14   : > { %p1054_p11 = pneg %p1368_p10  ;;  %p1145_p13 = scmp.ne.s32.totalorder %s1567_s1, %s1144_s21 }
  0x15   : > { %p1151_p3 = scmp.lt.u32.totalorder %s1144_s21, %s1567_s1 }
  0x16   : > { %p1376_p12 = pnand %p1574_p9, %p1054_p11 }
  0x18   : > { %p1146_p0 = pneg %p1376_p12 }
  0x1a   : > { %p1147_p1 = pnand %p1146_p0, %p1145_p13 }
  0x1c   : > { %p1148_p2 = pneg %p1147_p1 }
  0x1e   : > { %p1153_p4 = pnand %p1151_p3, %p1148_p2 }
  0x20   : > { %1156 = shalt.err (!%p1153_p4)
}
  0x21   : > { %s1157_s9 = scalar_lea.vmem %s218_s15, 256  ;;  %p1165_p9 = scmp.lt.s32.totalorder %s218_s15, %s218_s15 }
  0x22   : > { %p1158_p7 = scmp.ne.s32.totalorder %s218_s15, %s1157_s9  ;;  %p1166_p6 = scmp.lt.s32.totalorder %s1157_s9, %s1157_s9 }
  0x24   : > { %p1160_p8 = pnand %p1158_p7, %p1146_p0  ;;  %p1167_p5 = por %p1166_p6, %p1165_p9 }
  0x26   : > { %p1161_p11 = pneg %p1160_p8 }
  0x28   : > { %p1168_p10 = pnand %p1167_p5, %p1161_p11 }
  0x2a   : > { %1171 = shalt.err (!%p1168_p10)
}
  0x2b   : > { %s1274_s14 = smov 128   ;;  %s1275_s17 = smov 8  }
  0x2c   : > { %1057 = dma.hbm_to_vmem [thread:$0]  (!%p1376_p12), %s1567_s1, 256, %s218_s15, [#allocation3], %s1274_s14, %s1274_s14, %s1275_s17  }
  0x2d   : > { %s1172_s23 = scalar_lea.hbm %s1569_s3, 2048 }
  0x2e   : > { %p1173_p13 = scmp.ne.s32.totalorder %s1569_s3, %s1172_s23  ;;  %p1179_p9 = scmp.lt.u32.totalorder %s1172_s23, %s1569_s3 }
  0x30   : > { %p1175_p5 = pnand %p1173_p13, %p1146_p0 }
  0x32   : > { %p1176_p6 = pneg %p1175_p5 }
  0x34   : > { %p1181_p10 = pnand %p1179_p9, %p1176_p6 }
  0x36   : > { %1184 = shalt.err (!%p1181_p10)
}
  0x37   : > { %s1185_s15 = scalar_lea.vmem %s1380_s18, 2048  ;;  %p1193_p4 = scmp.lt.s32.totalorder %s1380_s18, %s1380_s18 }
  0x38   : > { %p1186_p1 = scmp.ne.s32.totalorder %s1380_s18, %s1185_s15  ;;  %p1194_p7 = scmp.lt.s32.totalorder %s1185_s15, %s1185_s15 }
  0x3a   : > { %p1188_p2 = pnand %p1186_p1, %p1146_p0  ;;  %p1195_p8 = por %p1194_p7, %p1193_p4 }
  0x3c   : > { %p1189_p3 = pneg %p1188_p2 }
  0x3e   : > { %p1196_p11 = pnand %p1195_p8, %p1189_p3 }
  0x40   : > { %1199 = shalt.err (!%p1196_p11)
}
  0x41   : > { %1060 = dma.hbm_to_vmem [thread:$0]  (!%p1376_p12), %s1569_s3, 2048, %s1380_s18, [#allocation6], %s1274_s14, %s1274_s14, %s1275_s17  }
  0x42   : > { %p1582_p13 = scmp.ne.s32.totalorder %s1580_s13, 0 }
  0x43   : > { %p1583_p5 = scmp.eq.s32.totalorder (!%p1582_p13), %s1340_s28, 0 }
  0x44   : > { %267 = sbr.rel (%p1582_p13) target bundleno = 793 (0x319), region = 48 }
  0x4b   : > { %1245 = dma.done.wait (%p1583_p5), [#allocation3], 256   ;;  %p1584_p0 = pmov %p1583_p5 }
  0x4d   : > { %1247 = vsyncadd (%p1584_p0), [#allocation3], 4294967040  ;;  %p1585_p6 = pmov %p1584_p0 }
  0x4e   : > { %p1586_p9 = pmov %p1584_p0 }
  0x4f   : > { %1249 = dma.done.wait (%p1585_p6), [#allocation6], 2048  }
  0x50   : > { %1251 = vsyncadd (%p1586_p9), [#allocation6], 4294965248  ;;  %s303_s16 = smul.u32 6, %s1340_s28  ;;  %vm325_vm0 = vcmask 130048   ;;  %v316_v0 = vld [vmem:[#allocation2] sm:$0xff]  ;;  %v317_v1 = vld [vmem:[#allocation2 + $0x8] sm:$0xff] }
  0x51   : > { %v975_v2 = vpack.c.bf16 %v317_v1, %v316_v0  ;;  %v445_v4 = vld [vmem:[#allocation5] sm:$0xff]  ;;  %v446_v5 = vld [vmem:[#allocation5 + $0x8] sm:$0xff]  ;;  %v447_v6 = vld [vmem:[#allocation5 + $0x10] sm:$0xff]  ;;  %s300_s10 = sand.u32 1, %s1262_s25   ;;  %p1587_p1 = scmp.ne.s32.totalorder %s1578_s11, 0 }
  0x52   : > { %p304_p10 = scmp.lt.s32.totalorder %s303_s16, 11  ;;  %v448_v7 = vld [vmem:[#allocation5 + $0x18] sm:$0xff]  ;;  %v979_v9 = vpack.c.bf16 %v446_v5, %v445_v4  ;;  %v449_v12 = vld [vmem:[#allocation5 + $0x20] sm:$0xff]  ;;  %v450_v13 = vld [vmem:[#allocation5 + $0x28] sm:$0xff]  ;;  %s1043_s19 = smul.u32 48, %s300_s10 }
  0x53   : > { %976 = vmatprep.subr.bf16.mxu0 %v975_v2  ;;  %v983_v10 = vpack.c.bf16 %v448_v7, %v447_v6  ;;  %v987_v15 = vpack.c.bf16 %v450_v13, %v449_v12  ;;  %v451_v17 = vld [vmem:[#allocation5 + $0x30] sm:$0xff]  ;;  %v452_v18 = vld [vmem:[#allocation5 + $0x38] sm:$0xff]  ;;  %v453_v21 = vld [vmem:[#allocation5 + $0x40] sm:$0xff]  ;;  %s1276_s22 = smov [#allocation7]  }
  0x54   : > { %s1595_s16 = smov (!%p304_p10, %s303_s16), 11  ;;  %978 = vmatpush3.bf16.msra.mxu0 %v975_v2  ;;  %980 = vmatprep.subr.bf16.mxu1 %v979_v9  ;;  %v991_v20 = vpack.c.bf16 %v452_v18, %v451_v17  ;;  %v454_v22 = vld [vmem:[#allocation5 + $0x48] sm:$0xff]  ;;  %v455_v24 = vld [vmem:[#allocation5 + $0x50] sm:$0xff]  ;;  %v456_v25 = vld [vmem:[#allocation5 + $0x58] sm:$0xff]  ;;  %s1204_s23 = sshll.u32 %s1276_s22, 4  ;;  %s1205_s23 = int_to_ptr.vmem [resolvable:$false] %s1204_s23 }
  0x55   : > { %s814_s18 = sshll.u32 %s1595_s16, 3  ;;  %982 = vmatpush3.bf16.msra.mxu1 %v979_v9  ;;  %v995_v23 = vpack.c.bf16 %v454_v22, %v453_v21  ;;  %v999_v26 = vpack.c.bf16 %v456_v25, %v455_v24  ;;  %v457_v27 = vld [vmem:[#allocation5 + $0x60] sm:$0xff]  ;;  %v458_v28 = vld [vmem:[#allocation5 + $0x68] sm:$0xff]  ;;  %v459_v30 = vld [vmem:[#allocation5 + $0x70] sm:$0xff]  ;;  %s302_s16 = scalar_lea.vmem [#allocation7], %s1043_s19 }
  0x56   : > { %s307_s17 = scalar_lea.vmem %s1566_s0, %s814_s18  ;;  %984 = vmatprep.subr.bf16.mxu1 %v983_v10  ;;  %v1003_v29 = vpack.c.bf16 %v458_v28, %v457_v27  ;;  %v460_v31 = vld [vmem:[#allocation5 + $0x78] sm:$0xff]  ;;  %v569_v33 = vld [vmem:[%s1571_s5] sm:$0xff]  ;;  %v571_v35 = vld [vmem:[%s1571_s5 + $0x10] sm:$0xff]  ;;  %s827_s18 = smul.u32 768, %s1340_s28 }
  0x57   : > { %v310_v3 = vld [vmem:[%s307_s17] sm:$0xff]  ;;  %v311_v8 = vld [vmem:[%s307_s17 + $0x8] sm:$0xff]  ;;  %v312_v11 = vld [vmem:[%s307_s17 + $0x10] sm:$0xff]  ;;  %v1007_v32 = vpack.c.bf16 %v460_v31, %v459_v30  ;;  %s722_s13 = sshll.u32 %s302_s16, 4  ;;  %s1525_s28 = scalar_lea.sflag [#allocation4], %s300_s10  ;;  %s1514_s13 = int_to_ptr.vmem [resolvable:$true] %s722_s13 }
  0x58   : > { %884 = vmatprep.mubr.msk.f32.mxu0 %vm325_vm0, %v310_v3  ;;  %v313_v14 = vld [vmem:[%s307_s17 + $0x18] sm:$0xff]  ;;  %v314_v16 = vld [vmem:[%s307_s17 + $0x20] sm:$0xff]  ;;  %v315_v19 = vld [vmem:[%s307_s17 + $0x28] sm:$0xff]  ;;  %s1519_s20 = scalar_lea.hbm %s1573_s7, %s827_s18  ;;  %s1200_s21 = scalar_lea.vmem %s1514_s13, 768 }
  0x59   : > { %885 = vmatmul.mubr.msk.f32.vlgmr.msra.gmra.mrb[0].mxu0 %vm325_vm0, %v311_v8  ;;  %986 = vmatpush3.bf16.msra.mxu1 %v983_v10  ;;  %v570_v34 = vld [vmem:[%s1571_s5 + $0x8] sm:$0xff]  ;;  %v572_v37 = vld [vmem:[%s1571_s5 + $0x18] sm:$0xff]  ;;  %v573_v39 = vld [vmem:[%s1571_s5 + $0x20] sm:$0xff]  ;;  %p1201_p12 = scmp.ne.s32.totalorder %s1514_s13, %s1200_s21  ;;  %s1206_s29 = scalar_lea.vmem %s1205_s23, 1536 }
  0x5a   : > { %887 = vmatprep.mubr.msk.f32.mxu0 %vm325_vm0, %v312_v11  ;;  %988 = vmatprep.subr.bf16.mxu1 %v987_v15  ;;  %v1011_v36 = vpack.c.bf16 %v570_v34, %v569_v33  ;;  %v1015_v38 = vpack.c.bf16 %v572_v37, %v571_v35  ;;  %v574_v40 = vld [vmem:[%s1571_s5 + $0x28] sm:$0xff]  ;;  %v575_v42 = vld [vmem:[%s1571_s5 + $0x30] sm:$0xff]  ;;  %v576_v43 = vld [vmem:[%s1571_s5 + $0x38] sm:$0xff]  ;;  %p1207_p4 = scmp.lt.s32.totalorder %s1514_s13, %s1205_s23  ;;  %p1208_p7 = scmp.lt.s32.totalorder %s1206_s29, %s1200_s21 }
  0x5b   : > { %v1019_v41 = vpack.c.bf16 %v574_v40, %v573_v39  ;;  %v1023_v44 = vpack.c.bf16 %v576_v43, %v575_v42  ;;  %v815_v45 = vld [vmem:[%s1568_s2] ss:$0 sm:$0xff]  ;;  %v578_v1 = vld [vmem:[%s1571_s5 + $0x48] sm:$0xff]  ;;  %v579_v3 = vld [vmem:[%s1571_s5 + $0x50] sm:$0xff]  ;;  %p1202_p2 = pnand %p1201_p12, %p1587_p1 }
  0x5c   : > { %1012 = vmatprep.subr.bf16.mxu0 %v1011_v36  ;;  %v577_v0 = vld [vmem:[%s1571_s5 + $0x40] sm:$0xff]  ;;  %v580_v4 = vld [vmem:[%s1571_s5 + $0x58] sm:$0xff]  ;;  %v582_v7 = vld [vmem:[%s1571_s5 + $0x68] sm:$0xff]  ;;  %p1209_p8 = por %p1208_p7, %p1207_p4 }
  0x5d   : > { %888 = vmatmul.mubr.msk.f32.gmra.mrb[2].mxu0 %vm325_vm0, %v313_v14  ;;  %990 = vmatpush3.bf16.msra.mxu1 %v987_v15  ;;  %v1027_v2 = vpack.c.bf16 %v578_v1, %v577_v0  ;;  %v1031_v5 = vpack.c.bf16 %v580_v4, %v579_v3  ;;  %v581_v6 = vld [vmem:[%s1571_s5 + $0x60] sm:$0xff]  ;;  %v583_v9 = vld [vmem:[%s1571_s5 + $0x70] sm:$0xff]  ;;  %v584_v10 = vld [vmem:[%s1571_s5 + $0x78] sm:$0xff]  ;;  %p1203_p3 = pneg %p1202_p2 }
  0x5e   : > { %890 = vmatprep.mubr.msk.f32.mxu0 %vm325_vm0, %v314_v16  ;;  %992 = vmatprep.subr.bf16.mxu1 %v991_v20  ;;  %v1035_v8 = vpack.c.bf16 %v582_v7, %v581_v6  ;;  %v1039_v11 = vpack.c.bf16 %v584_v10, %v583_v9  ;;  %v822_v12 = vld [vmem:[%s1570_s4] ss:$0 sm:$0xff] }
  0x5f   : > { %1014 = vmatpush3.bf16.msra.mxu0 %v1011_v36  ;;  %v823_v31 = vld [vmem:[%s1572_s6] ss:$0 sm:$0xff]  ;;  %v687_v36 = vlaneseq  ;;  %p1210_p11 = pnand %p1209_p8, %p1203_p3 }
  0x60   : > { %1016 = vmatprep.subr.bf16.mxu0 %v1015_v38 }
  0x61   : > { %891 = vmatmul.mubr.msk.f32.gmra.mrb[4].mxu0 %vm325_vm0, %v315_v19  ;;  %994 = vmatpush3.bf16.msra.mxu1 %v991_v20 }
  0x62   : > { %996 = vmatprep.subr.bf16.mxu1 %v995_v23 }
  0x63   : > { %1018 = vmatpush3.bf16.msra.mxu0 %v1015_v38 }
  0x64   : > { %1020 = vmatprep.subr.bf16.mxu0 %v1019_v41 }
  0x65   : > { %998 = vmatpush3.bf16.msra.mxu1 %v995_v23 }
  0x66   : > { %1000 = vmatprep.subr.bf16.mxu1 %v999_v26 }
  0x67   : > { %1022 = vmatpush3.bf16.msra.mxu0 %v1019_v41  ;;  %v688_v41 = vand.u32 127, %v687_v36 }
  0x68   : > { %1024 = vmatprep.subr.bf16.mxu0 %v1023_v44 }
  0x69   : > { %1002 = vmatpush3.bf16.msra.mxu1 %v999_v26  ;;  %vm689_vm1 = vcmp.lt.s32.totalorder %v688_v41, 8 }
  0x6a   : > { %1004 = vmatprep.subr.bf16.mxu1 %v1003_v29 }
  0x6b   : > { %1026 = vmatpush3.bf16.msra.mxu0 %v1023_v44 }
  0x6c   : > { %1028 = vmatprep.subr.bf16.mxu0 %v1027_v2 }
  0x6d   : > { %1006 = vmatpush3.bf16.msra.mxu1 %v1003_v29 }
  0x6e   : > { %1008 = vmatprep.subr.bf16.mxu1 %v1007_v32 }
  0x6f   : > { %1030 = vmatpush3.bf16.msra.mxu0 %v1027_v2 }
  0x70   : > { %1032 = vmatprep.subr.bf16.mxu0 %v1031_v5 }
  0x71   : > { %1010 = vmatpush3.bf16.msra.mxu1 %v1007_v32 }
  0x73   : > { %1034 = vmatpush3.bf16.msra.mxu0 %v1031_v5 }
  0x74   : > { %1036 = vmatprep.subr.bf16.mxu0 %v1035_v8 }
  0x77   : > { %1038 = vmatpush3.bf16.msra.mxu0 %v1035_v8 }
  0x78   : > { %1040 = vmatprep.subr.bf16.mxu0 %v1039_v11 }
  0x7b   : > { %1042 = vmatpush3.bf16.msra.mxu0 %v1039_v11 }
 0x12c   : > { %v886_v46 = vpop.f32.mrb[0].mxu0 }
 0x12d   : > { %v416_v47 = vadd.f32 %v886_v46, %v815_v45  ;;  %v410_v48 = vpop.f32.mrb[1].mxu0 }
 0x12e   : > { %v411_v49 = vadd.f32 %v815_v45, %v410_v48 }
 0x130   : > { %1108 = vtanh.f32 %v411_v49  ;;  %v889_v50 = vpop.f32.mrb[2].mxu0 }
 0x131   : > { %1110 = vtanh.f32 %v416_v47  ;;  %v426_v51 = vadd.f32 %v889_v50, %v815_v45  ;;  %v420_v52 = vpop.f32.mrb[3].mxu0 }
 0x132   : > { %v421_v53 = vadd.f32 %v815_v45, %v420_v52 }
 0x134   : > { %1112 = vtanh.f32 %v421_v53  ;;  %v892_v54 = vpop.f32.mrb[4].mxu0 }
 0x135   : > { %1114 = vtanh.f32 %v426_v51  ;;  %v436_v55 = vadd.f32 %v892_v54, %v815_v45  ;;  %v430_v56 = vpop.f32.mrb[5].mxu0 }
 0x136   : > { %v431_v57 = vadd.f32 %v815_v45, %v430_v56 }
 0x138   : > { %1116 = vtanh.f32 %v431_v57 }
 0x139   : > { %1118 = vtanh.f32 %v436_v55 }
 0x13a   : > { %v1109_v58 = vpop.eup %1108 }
 0x13b   : > { %v1111_v59 = vpop.eup %1110  ;;  %925 = vmatprep.mubr.f32.mxu1 %v1109_v58 }
 0x13c   : > { %926 = vmatmul.mubr.f32.vlgmr.msra.gmra.mrb[0].mxu1 %v1111_v59 }
 0x13e   : > { %v1113_v60 = vpop.eup %1112 }
 0x13f   : > { %v1115_v61 = vpop.eup %1114  ;;  %928 = vmatprep.mubr.f32.mxu1 %v1113_v60 }
 0x140   : > { %929 = vmatmul.mubr.f32.gmra.mrb[2].mxu1 %v1115_v61 }
 0x142   : > { %v1117_v62 = vpop.eup %1116 }
 0x143   : > { %v1119_v63 = vpop.eup %1118  ;;  %931 = vmatprep.mubr.f32.mxu1 %v1117_v62 }
 0x144   : > { %932 = vmatmul.mubr.f32.gmra.mrb[4].mxu1 %v1119_v63 }
 0x20f   : > { %v927_v13 = vpop.f32.mrb[0].mxu1 }
 0x210   : > { %v540_v14 = vadd.f32 %v927_v13, %v822_v12  ;;  %v534_v15 = vpop.f32.mrb[1].mxu1 }
 0x211   : > { %v535_v16 = vadd.f32 %v822_v12, %v534_v15 }
 0x213   : > { %1120 = vtanh.f32 %v535_v16  ;;  %v930_v17 = vpop.f32.mrb[2].mxu1 }
 0x214   : > { %1122 = vtanh.f32 %v540_v14  ;;  %v550_v18 = vadd.f32 %v930_v17, %v822_v12  ;;  %v544_v19 = vpop.f32.mrb[3].mxu1 }
 0x215   : > { %v545_v20 = vadd.f32 %v822_v12, %v544_v19 }
 0x217   : > { %1124 = vtanh.f32 %v545_v20  ;;  %v933_v21 = vpop.f32.mrb[4].mxu1 }
 0x218   : > { %1126 = vtanh.f32 %v550_v18  ;;  %v560_v22 = vadd.f32 %v933_v21, %v822_v12  ;;  %v554_v23 = vpop.f32.mrb[5].mxu1 }
 0x219   : > { %v555_v24 = vadd.f32 %v822_v12, %v554_v23 }
 0x21b   : > { %1128 = vtanh.f32 %v555_v24 }
 0x21c   : > { %1130 = vtanh.f32 %v560_v22 }
 0x21d   : > { %v1121_v25 = vpop.eup %1120 }
 0x21e   : > { %v1123_v26 = vpop.eup %1122  ;;  %966 = vmatprep.mubr.f32.mxu0 %v1121_v25 }
 0x21f   : > { %967 = vmatmul.mubr.f32.vlgmr.msra.gmra.mrb[6].mxu0 %v1123_v26 }
 0x221   : > { %v1125_v27 = vpop.eup %1124 }
 0x222   : > { %v1127_v28 = vpop.eup %1126  ;;  %969 = vmatprep.mubr.f32.mxu0 %v1125_v27 }
 0x223   : > { %970 = vmatmul.mubr.f32.gmra.mrb[8].mxu0 %v1127_v28 }
 0x225   : > { %v1129_v29 = vpop.eup %1128 }
 0x226   : > { %v1131_v30 = vpop.eup %1130  ;;  %972 = vmatprep.mubr.f32.mxu0 %v1129_v29 }
 0x227   : > { %973 = vmatmul.mubr.f32.gmra.mrb[10].mxu0 %v1131_v30 }
 0x2f2   : > { %v968_v32 = vpop.f32.mrb[6].mxu0 }
 0x2f3   : > { %v664_v33 = vadd.f32 %v968_v32, %v823_v31  ;;  %v658_v34 = vpop.f32.mrb[7].mxu0 }
 0x2f4   : > { %v659_v35 = vadd.f32 %v823_v31, %v658_v34 }
 0x2f5   : > { %1132 = vtanh.f32 %v664_v33 }
 0x2f6   : > { %1134 = vtanh.f32 %v659_v35  ;;  %v971_v37 = vpop.f32.mrb[8].mxu0 }
 0x2f7   : > { %v674_v38 = vadd.f32 %v971_v37, %v823_v31  ;;  %v668_v39 = vpop.f32.mrb[9].mxu0 }
 0x2f8   : > { %v669_v40 = vadd.f32 %v823_v31, %v668_v39 }
 0x2f9   : > { %1136 = vtanh.f32 %v674_v38 }
 0x2fa   : > { %1138 = vtanh.f32 %v669_v40  ;;  %v974_v42 = vpop.f32.mrb[10].mxu0 }
 0x2fb   : > { %v684_v43 = vadd.f32 %v974_v42, %v823_v31  ;;  %v678_v44 = vpop.f32.mrb[11].mxu0 }
 0x2fc   : > { %v679_v45 = vadd.f32 %v823_v31, %v678_v44 }
 0x2fd   : > { %1140 = vtanh.f32 %v684_v43 }
 0x2fe   : > { %1142 = vtanh.f32 %v679_v45 }
 0x2ff   : > { %v1133_v46 = vpop.eup %1132 }
 0x300   : > { %v1135_v47 = vpop.eup %1134  ;;  %v697_v48 = vsel %vm689_vm1, %v1133_v46, %v664_v33 }
 0x301   : > { %703 = vst [vmem:[%s302_s16 + $0x8] sm:$0xff] %v697_v48  ;;  %v696_v49 = vsel %vm689_vm1, %v1135_v47, %v659_v35 }
 0x302   : > { %702 = vst [vmem:[%s302_s16] sm:$0xff] %v696_v49 }
 0x303   : > { %v1137_v50 = vpop.eup %1136 }
 0x304   : > { %v1139_v51 = vpop.eup %1138  ;;  %v699_v52 = vsel %vm689_vm1, %v1137_v50, %v674_v38 }
 0x305   : > { %705 = vst [vmem:[%s302_s16 + $0x18] sm:$0xff] %v699_v52  ;;  %v698_v53 = vsel %vm689_vm1, %v1139_v51, %v669_v40 }
 0x306   : > { %704 = vst [vmem:[%s302_s16 + $0x10] sm:$0xff] %v698_v53 }
 0x307   : > { %v1141_v54 = vpop.eup %1140 }
 0x308   : > { %v1143_v55 = vpop.eup %1142  ;;  %v701_v56 = vsel %vm689_vm1, %v1141_v54, %v684_v43 }
 0x309   : > { %707 = vst [vmem:[%s302_s16 + $0x28] sm:$0xff] %v701_v56  ;;  %v700_v57 = vsel %vm689_vm1, %v1143_v55, %v679_v45 }
 0x30a   : > { %706 = vst [vmem:[%s302_s16 + $0x20] sm:$0xff] %v700_v57 }
 0x30b   : > { %1213 = shalt.err (!%p1210_p11)
}
 0x30c   : > { %s1214_s8 = scalar_lea.hbm %s1519_s20, 768  ;;  %s1218_s10 = scalar_lea.hbm %s1573_s7, 1536 }
 0x30d   : > { %p1215_p13 = scmp.ne.s32.totalorder %s1519_s20, %s1214_s8  ;;  %p1219_p6 = scmp.lt.u32.totalorder %s1519_s20, %s1573_s7 }
 0x30e   : > { %p1220_p9 = scmp.lt.u32.totalorder %s1218_s10, %s1214_s8  ;;  %p1222_p12 = scmp.lt.u32.totalorder %s1214_s8, %s1519_s20 }
 0x30f   : > { %p1216_p5 = pnand %p1215_p13, %p1587_p1 }
 0x310   : > { %p1221_p10 = por %p1220_p9, %p1219_p6 }
 0x311   : > { %p1217_p0 = pneg %p1216_p5 }
 0x312   : > { %p1223_p2 = por %p1222_p12, %p1221_p10 }
 0x314   : > { %p1224_p3 = pnand %p1223_p2, %p1217_p0 }
 0x316   : > { %1227 = shalt.err (!%p1224_p3)
}
 0x317   : > { %s1277_s18 = smov 128   ;;  %s1278_s14 = smov 8  }
 0x318   : > { %1052 = dma.vmem_to_hbm [thread:$0]  (%p1587_p1), %s1514_s13, 768, %s1519_s20, %s1525_s28, %s1277_s18, %s1277_s18, %s1278_s14  }
 0x319 PF: > { %p1069_p4 = scmp.ge.s32.totalorder %s1270_s27, 2  ;;  %s737_s17 = sand.u32 1, %s1258_s24  }
 0x31a   : > { %p1588_p7 = scmp.ne.s32.totalorder %s1579_s12, 0  ;;  %s738_s21 = scalar_lea.sflag [#allocation4], %s737_s17 }
 0x31c   : > { %p1062_p8 = pnand %p1069_p4, %p1588_p7 }
 0x31e   : > { %1253 = dma.done.wait (!%p1062_p8), %s738_s21, 768  }
 0x31f   : > { %1255 = vsyncadd (!%p1062_p8), %s738_s21, 4294966528  ;;  %s1589_s22 = sld [smem:[#allocation11_spill]]  ;;  %p19_p11 = scmp.ge.s32.totalorder %s1344_s30, 4  }
 0x320   : > { %s1590_s24 = smov %s1262_s25  ;;  %s1591_s25 = smov %s1266_s26 }
 0x321   : > { %s1593_s27 = smov %s1344_s30  ;;  %21 = sbr.rel (!%p19_p11) target bundleno = 5 (0x5), region = 92 }
 0x325   : > { %s1592_s26 = smov %s1589_s22 }
 0x328   :  { %743 = vsyncpa [#allocation3], 1 }
 0x329   :  { %745 = vsyncpa [#allocation3 + $0x1], 1 }
 0x32a   :  { %746 = vsyncpa [#allocation6], 1 }
 0x32b   :  { %747 = vsyncpa [#allocation4], 1 }
 0x32c   :  { %749 = vsyncpa [#allocation4 + $0x1], 1 }

// kernel: tpu_custom_call.1
= control target key start
LH: loop header
LB: loop body
LE: loop exit
PB: predicated region body
PF: predicated region fallthrough
CT: control target
= control target key end

     0   :  { %12 = vsyncpa [#allocation3], 0  ;;  %s1566_s0 = inlined_call_operand.vmem [shape: f32[96,16], index: 0, kind: input, shape index: {}]   ;;  %s1567_s1 = inlined_call_operand.hbm [shape: f32[16,128], index: 1, kind: input, shape index: {}]   ;;  %s1568_s2 = inlined_call_operand.vmem [shape: f32[1,128], index: 2, kind: input, shape index: {}]   ;;  %s1569_s3 = inlined_call_operand.hbm [shape: f32[128,128], index: 3, kind: input, shape index: {}]   ;;  %s1570_s4 = inlined_call_operand.vmem [shape: f32[1,128], index: 4, kind: input, shape index: {}]   ;;  %s1571_s5 = inlined_call_operand.vmem [shape: f32[128,128], index: 5, kind: input, shape index: {}]   ;;  %s1572_s6 = inlined_call_operand.vmem [shape: f32[1,128], index: 6, kind: input, shape index: {}]   ;;  %s1573_s7 = inlined_call_operand.hbm [shape: f32[96,128], index: 7, kind: output, shape index: {}]  }
   0x1   :  { %13 = vsyncpa [#allocation6], 0 }
   0x2   :  { %14 = vsyncpa [#allocation4], 0 }
   0x3   :  { %16 = vsyncpa [#allocation4 + $0x1], 0  ;;  %s1319_s24 = smov 0   ;;  %s1321_s25 = smov 0  }
   0x4   :  { %s1323_s26 = smov 0   ;;  %s1325_s27 = smov 0  }
   0x5 LB: > { %s1340_s28 = sadd.s32 4294967295, %s1270_s27   ;;  %s806_s29 = sadd.s32 4294967294, %s1270_s27   ;;  %s1270_s27 = sphi %s1325_s27, %s1593_s27   ;;  %s1266_s26 = sphi %s1323_s26, %s1592_s26   ;;  %s1262_s25 = sphi %s1321_s25, %s1591_s25   ;;  %s1258_s24 = sphi %s1319_s24, %s1590_s24  }
   0x6   : > { %s1344_s30 = sadd.s32 1, %s1270_s27   ;;  %s181_s8 = sadd.s32 1, %s1266_s26 }
   0x7   : > { %s178_s9 = ssub.s32 %s1270_s27, %s1344_s30  ;;  %p191_p0 = scmp.ne.s32.totalorder %s1266_s26, %s1262_s25 }
   0x8   : > { %p179_p1 = scmp.eq.s32.totalorder %s178_s9, 0  ;;  %p192_p2 = scmp.eq.s32.totalorder %s1340_s28, 1 }
   0x9   : > { %p197_p3 = scmp.ne.s32.totalorder %s1262_s25, %s1258_s24  ;;  %p198_p4 = scmp.eq.s32.totalorder %s806_s29, 1 }
   0xa   : > { %s1355_s10 = scalar_select %p179_p1, %s1266_s26, %s181_s8  }
   0xb   : > { %p1357_p5 = por %p192_p2, %p191_p0  ;;  %p1361_p6 = por %p198_p4, %p197_p3 }
   0xc   : > { %1577 = sst [smem:[#allocation11_spill]] %s1355_s10  ;;  %p807_p7 = scmp.ge.s32.totalorder %s1270_s27, 1 }
   0xd   : > { %s1578_s11 = scalar_select %p1357_p5, 1, 0 }
   0xe   : > { %s1579_s12 = scalar_select %p1361_p6, 1, 0 }
   0xf   : > { %p205_p8 = scmp.lt.s32.totalorder %s1270_s27, 3  ;;  %p1574_p9 = scmp.eq.s32.totalorder %s1340_s28, 0 }
  0x10   : > { %s1272_s14 = smov [#allocation2]   ;;  %s1273_s17 = smov [#allocation5]  }
  0x11   : > { %p1368_p10 = pnand %p807_p7, %p205_p8  ;;  %s217_s15 = sshll.u32 %s1272_s14, 4  ;;  %s218_s15 = int_to_ptr.vmem [resolvable:$true] %s217_s15 }
  0x12   : > { %s233_s18 = sshll.u32 %s1273_s17, 4  ;;  %s1144_s21 = scalar_lea.hbm %s1567_s1, 256  ;;  %s1380_s18 = int_to_ptr.vmem [resolvable:$true] %s233_s18 }
  0x13   : > { %s1580_s13 = scalar_select %p1368_p10, 1, 0 }
  0x14   : > { %p1054_p11 = pneg %p1368_p10  ;;  %p1145_p13 = scmp.ne.s32.totalorder %s1567_s1, %s1144_s21 }
  0x15   : > { %p1151_p3 = scmp.lt.u32.totalorder %s1144_s21, %s1567_s1 }
  0x16   : > { %p1376_p12 = pnand %p1574_p9, %p1054_p11 }
  0x18   : > { %p1146_p0 = pneg %p1376_p12 }
  0x1a   : > { %p1147_p1 = pnand %p1146_p0, %p1145_p13 }
  0x1c   : > { %p1148_p2 = pneg %p1147_p1 }
  0x1e   : > { %p1153_p4 = pnand %p1151_p3, %p1148_p2 }
  0x20   : > { %1156 = shalt.err (!%p1153_p4)
}
  0x21   : > { %s1157_s9 = scalar_lea.vmem %s218_s15, 256  ;;  %p1165_p9 = scmp.lt.s32.totalorder %s218_s15, %s218_s15 }
  0x22   : > { %p1158_p7 = scmp.ne.s32.totalorder %s218_s15, %s1157_s9  ;;  %p1166_p6 = scmp.lt.s32.totalorder %s1157_s9, %s1157_s9 }
  0x24   : > { %p1160_p8 = pnand %p1158_p7, %p1146_p0  ;;  %p1167_p5 = por %p1166_p6, %p1165_p9 }
  0x26   : > { %p1161_p11 = pneg %p1160_p8 }
  0x28   : > { %p1168_p10 = pnand %p1167_p5, %p1161_p11 }
  0x2a   : > { %1171 = shalt.err (!%p1168_p10)
}
  0x2b   : > { %s1274_s14 = smov 128   ;;  %s1275_s17 = smov 8  }
  0x2c   : > { %1057 = dma.hbm_to_vmem [thread:$0]  (!%p1376_p12), %s1567_s1, 256, %s218_s15, [#allocation3], %s1274_s14, %s1274_s14, %s1275_s17  }
  0x2d   : > { %s1172_s23 = scalar_lea.hbm %s1569_s3, 2048 }
  0x2e   : > { %p1173_p13 = scmp.ne.s32.totalorder %s1569_s3, %s1172_s23  ;;  %p1179_p9 = scmp.lt.u32.totalorder %s1172_s23, %s1569_s3 }
  0x30   : > { %p1175_p5 = pnand %p1173_p13, %p1146_p0 }
  0x32   : > { %p1176_p6 = pneg %p1175_p5 }
  0x34   : > { %p1181_p10 = pnand %p1179_p9, %p1176_p6 }
  0x36   : > { %1184 = shalt.err (!%p1181_p10)
}
  0x37   : > { %s1185_s15 = scalar_lea.vmem %s1380_s18, 2048  ;;  %p1193_p4 = scmp.lt.s32.totalorder %s1380_s18, %s1380_s18 }
  0x38   : > { %p1186_p1 = scmp.ne.s32.totalorder %s1380_s18, %s1185_s15  ;;  %p1194_p7 = scmp.lt.s32.totalorder %s1185_s15, %s1185_s15 }
  0x3a   : > { %p1188_p2 = pnand %p1186_p1, %p1146_p0  ;;  %p1195_p8 = por %p1194_p7, %p1193_p4 }
  0x3c   : > { %p1189_p3 = pneg %p1188_p2 }
  0x3e   : > { %p1196_p11 = pnand %p1195_p8, %p1189_p3 }
  0x40   : > { %1199 = shalt.err (!%p1196_p11)
}
  0x41   : > { %1060 = dma.hbm_to_vmem [thread:$0]  (!%p1376_p12), %s1569_s3, 2048, %s1380_s18, [#allocation6], %s1274_s14, %s1274_s14, %s1275_s17  }
  0x42   : > { %p1582_p13 = scmp.ne.s32.totalorder %s1580_s13, 0 }
  0x43   : > { %p1583_p5 = scmp.eq.s32.totalorder (!%p1582_p13), %s1340_s28, 0 }
  0x44   : > { %267 = sbr.rel (%p1582_p13) target bundleno = 793 (0x319), region = 48 }
  0x4b   : > { %1245 = dma.done.wait (%p1583_p5), [#allocation3], 256   ;;  %p1584_p0 = pmov %p1583_p5 }
  0x4d   : > { %1247 = vsyncadd (%p1584_p0), [#allocation3], 4294967040  ;;  %p1585_p6 = pmov %p1584_p0 }
  0x4e   : > { %p1586_p9 = pmov %p1584_p0 }
  0x4f   : > { %1249 = dma.done.wait (%p1585_p6), [#allocation6], 2048  }
  0x50   : > { %1251 = vsyncadd (%p1586_p9), [#allocation6], 4294965248  ;;  %s303_s16 = smul.u32 6, %s1340_s28  ;;  %vm325_vm0 = vcmask 130048   ;;  %v316_v0 = vld [vmem:[#allocation2] sm:$0xff]  ;;  %v317_v1 = vld [vmem:[#allocation2 + $0x8] sm:$0xff] }
  0x51   : > { %v975_v2 = vpack.c.bf16 %v317_v1, %v316_v0  ;;  %v445_v4 = vld [vmem:[#allocation5] sm:$0xff]  ;;  %v446_v5 = vld [vmem:[#allocation5 + $0x8] sm:$0xff]  ;;  %v447_v6 = vld [vmem:[#allocation5 + $0x10] sm:$0xff]  ;;  %s300_s10 = sand.u32 1, %s1262_s25   ;;  %p1587_p1 = scmp.ne.s32.totalorder %s1578_s11, 0 }
  0x52   : > { %p304_p10 = scmp.lt.s32.totalorder %s303_s16, 11  ;;  %v448_v7 = vld [vmem:[#allocation5 + $0x18] sm:$0xff]  ;;  %v979_v9 = vpack.c.bf16 %v446_v5, %v445_v4  ;;  %v449_v12 = vld [vmem:[#allocation5 + $0x20] sm:$0xff]  ;;  %v450_v13 = vld [vmem:[#allocation5 + $0x28] sm:$0xff]  ;;  %s1043_s19 = smul.u32 48, %s300_s10 }
  0x53   : > { %976 = vmatprep.subr.bf16.mxu0 %v975_v2  ;;  %v983_v10 = vpack.c.bf16 %v448_v7, %v447_v6  ;;  %v987_v15 = vpack.c.bf16 %v450_v13, %v449_v12  ;;  %v451_v17 = vld [vmem:[#allocation5 + $0x30] sm:$0xff]  ;;  %v452_v18 = vld [vmem:[#allocation5 + $0x38] sm:$0xff]  ;;  %v453_v21 = vld [vmem:[#allocation5 + $0x40] sm:$0xff]  ;;  %s1276_s22 = smov [#allocation7]  }
  0x54   : > { %s1595_s16 = smov (!%p304_p10, %s303_s16), 11  ;;  %978 = vmatpush3.bf16.msra.mxu0 %v975_v2  ;;  %980 = vmatprep.subr.bf16.mxu1 %v979_v9  ;;  %v991_v20 = vpack.c.bf16 %v452_v18, %v451_v17  ;;  %v454_v22 = vld [vmem:[#allocation5 + $0x48] sm:$0xff]  ;;  %v455_v24 = vld [vmem:[#allocation5 + $0x50] sm:$0xff]  ;;  %v456_v25 = vld [vmem:[#allocation5 + $0x58] sm:$0xff]  ;;  %s1204_s23 = sshll.u32 %s1276_s22, 4  ;;  %s1205_s23 = int_to_ptr.vmem [resolvable:$false] %s1204_s23 }
  0x55   : > { %s814_s18 = sshll.u32 %s1595_s16, 3  ;;  %982 = vmatpush3.bf16.msra.mxu1 %v979_v9  ;;  %v995_v23 = vpack.c.bf16 %v454_v22, %v453_v21  ;;  %v999_v26 = vpack.c.bf16 %v456_v25, %v455_v24  ;;  %v457_v27 = vld [vmem:[#allocation5 + $0x60] sm:$0xff]  ;;  %v458_v28 = vld [vmem:[#allocation5 + $0x68] sm:$0xff]  ;;  %v459_v30 = vld [vmem:[#allocation5 + $0x70] sm:$0xff]  ;;  %s302_s16 = scalar_lea.vmem [#allocation7], %s1043_s19 }
  0x56   : > { %s307_s17 = scalar_lea.vmem %s1566_s0, %s814_s18  ;;  %984 = vmatprep.subr.bf16.mxu1 %v983_v10  ;;  %v1003_v29 = vpack.c.bf16 %v458_v28, %v457_v27  ;;  %v460_v31 = vld [vmem:[#allocation5 + $0x78] sm:$0xff]  ;;  %v569_v33 = vld [vmem:[%s1571_s5] sm:$0xff]  ;;  %v571_v35 = vld [vmem:[%s1571_s5 + $0x10] sm:$0xff]  ;;  %s827_s18 = smul.u32 768, %s1340_s28 }
  0x57   : > { %v310_v3 = vld [vmem:[%s307_s17] sm:$0xff]  ;;  %v311_v8 = vld [vmem:[%s307_s17 + $0x8] sm:$0xff]  ;;  %v312_v11 = vld [vmem:[%s307_s17 + $0x10] sm:$0xff]  ;;  %v1007_v32 = vpack.c.bf16 %v460_v31, %v459_v30  ;;  %s722_s13 = sshll.u32 %s302_s16, 4  ;;  %s1525_s28 = scalar_lea.sflag [#allocation4], %s300_s10  ;;  %s1514_s13 = int_to_ptr.vmem [resolvable:$true] %s722_s13 }
  0x58   : > { %884 = vmatprep.mubr.msk.f32.mxu0 %vm325_vm0, %v310_v3  ;;  %v313_v14 = vld [vmem:[%s307_s17 + $0x18] sm:$0xff]  ;;  %v314_v16 = vld [vmem:[%s307_s17 + $0x20] sm:$0xff]  ;;  %v315_v19 = vld [vmem:[%s307_s17 + $0x28] sm:$0xff]  ;;  %s1519_s20 = scalar_lea.hbm %s1573_s7, %s827_s18  ;;  %s1200_s21 = scalar_lea.vmem %s1514_s13, 768 }
  0x59   : > { %885 = vmatmul.mubr.msk.f32.vlgmr.msra.gmra.mrb[0].mxu0 %vm325_vm0, %v311_v8  ;;  %986 = vmatpush3.bf16.msra.mxu1 %v983_v10  ;;  %v570_v34 = vld [vmem:[%s1571_s5 + $0x8] sm:$0xff]  ;;  %v572_v37 = vld [vmem:[%s1571_s5 + $0x18] sm:$0xff]  ;;  %v573_v39 = vld [vmem:[%s1571_s5 + $0x20] sm:$0xff]  ;;  %p1201_p12 = scmp.ne.s32.totalorder %s1514_s13, %s1200_s21  ;;  %s1206_s29 = scalar_lea.vmem %s1205_s23, 1536 }
  0x5a   : > { %887 = vmatprep.mubr.msk.f32.mxu0 %vm325_vm0, %v312_v11  ;;  %988 = vmatprep.subr.bf16.mxu1 %v987_v15  ;;  %v1011_v36 = vpack.c.bf16 %v570_v34, %v569_v33  ;;  %v1015_v38 = vpack.c.bf16 %v572_v37, %v571_v35  ;;  %v574_v40 = vld [vmem:[%s1571_s5 + $0x28] sm:$0xff]  ;;  %v575_v42 = vld [vmem:[%s1571_s5 + $0x30] sm:$0xff]  ;;  %v576_v43 = vld [vmem:[%s1571_s5 + $0x38] sm:$0xff]  ;;  %p1207_p4 = scmp.lt.s32.totalorder %s1514_s13, %s1205_s23  ;;  %p1208_p7 = scmp.lt.s32.totalorder %s1206_s29, %s1200_s21 }
  0x5b   : > { %v1019_v41 = vpack.c.bf16 %v574_v40, %v573_v39  ;;  %v1023_v44 = vpack.c.bf16 %v576_v43, %v575_v42  ;;  %v815_v45 = vld [vmem:[%s1568_s2] ss:$0 sm:$0xff]  ;;  %v578_v1 = vld [vmem:[%s1571_s5 + $0x48] sm:$0xff]  ;;  %v579_v3 = vld [vmem:[%s1571_s5 + $0x50] sm:$0xff]  ;;  %p1202_p2 = pnand %p1201_p12, %p1587_p1 }
  0x5c   : > { %1012 = vmatprep.subr.bf16.mxu0 %v1011_v36  ;;  %v577_v0 = vld [vmem:[%s1571_s5 + $0x40] sm:$0xff]  ;;  %v580_v4 = vld [vmem:[%s1571_s5 + $0x58] sm:$0xff]  ;;  %v582_v7 = vld [vmem:[%s1571_s5 + $0x68] sm:$0xff]  ;;  %p1209_p8 = por %p1208_p7, %p1207_p4 }
  0x5d   : > { %888 = vmatmul.mubr.msk.f32.gmra.mrb[2].mxu0 %vm325_vm0, %v313_v14  ;;  %990 = vmatpush3.bf16.msra.mxu1 %v987_v15  ;;  %v1027_v2 = vpack.c.bf16 %v578_v1, %v577_v0  ;;  %v1031_v5 = vpack.c.bf16 %v580_v4, %v579_v3  ;;  %v581_v6 = vld [vmem:[%s1571_s5 + $0x60] sm:$0xff]  ;;  %v583_v9 = vld [vmem:[%s1571_s5 + $0x70] sm:$0xff]  ;;  %v584_v10 = vld [vmem:[%s1571_s5 + $0x78] sm:$0xff]  ;;  %p1203_p3 = pneg %p1202_p2 }
  0x5e   : > { %890 = vmatprep.mubr.msk.f32.mxu0 %vm325_vm0, %v314_v16  ;;  %992 = vmatprep.subr.bf16.mxu1 %v991_v20  ;;  %v1035_v8 = vpack.c.bf16 %v582_v7, %v581_v6  ;;  %v1039_v11 = vpack.c.bf16 %v584_v10, %v583_v9  ;;  %v822_v12 = vld [vmem:[%s1570_s4] ss:$0 sm:$0xff] }
  0x5f   : > { %1014 = vmatpush3.bf16.msra.mxu0 %v1011_v36  ;;  %v823_v31 = vld [vmem:[%s1572_s6] ss:$0 sm:$0xff]  ;;  %v687_v36 = vlaneseq  ;;  %p1210_p11 = pnand %p1209_p8, %p1203_p3 }
  0x60   : > { %1016 = vmatprep.subr.bf16.mxu0 %v1015_v38 }
  0x61   : > { %891 = vmatmul.mubr.msk.f32.gmra.mrb[4].mxu0 %vm325_vm0, %v315_v19  ;;  %994 = vmatpush3.bf16.msra.mxu1 %v991_v20 }
  0x62   : > { %996 = vmatprep.subr.bf16.mxu1 %v995_v23 }
  0x63   : > { %1018 = vmatpush3.bf16.msra.mxu0 %v1015_v38 }
  0x64   : > { %1020 = vmatprep.subr.bf16.mxu0 %v1019_v41 }
  0x65   : > { %998 = vmatpush3.bf16.msra.mxu1 %v995_v23 }
  0x66   : > { %1000 = vmatprep.subr.bf16.mxu1 %v999_v26 }
  0x67   : > { %1022 = vmatpush3.bf16.msra.mxu0 %v1019_v41  ;;  %v688_v41 = vand.u32 127, %v687_v36 }
  0x68   : > { %1024 = vmatprep.subr.bf16.mxu0 %v1023_v44 }
  0x69   : > { %1002 = vmatpush3.bf16.msra.mxu1 %v999_v26  ;;  %vm689_vm1 = vcmp.lt.s32.totalorder %v688_v41, 8 }
  0x6a   : > { %1004 = vmatprep.subr.bf16.mxu1 %v1003_v29 }
  0x6b   : > { %1026 = vmatpush3.bf16.msra.mxu0 %v1023_v44 }
  0x6c   : > { %1028 = vmatprep.subr.bf16.mxu0 %v1027_v2 }
  0x6d   : > { %1006 = vmatpush3.bf16.msra.mxu1 %v1003_v29 }
  0x6e   : > { %1008 = vmatprep.subr.bf16.mxu1 %v1007_v32 }
  0x6f   : > { %1030 = vmatpush3.bf16.msra.mxu0 %v1027_v2 }
  0x70   : > { %1032 = vmatprep.subr.bf16.mxu0 %v1031_v5 }
  0x71   : > { %1010 = vmatpush3.bf16.msra.mxu1 %v1007_v32 }
  0x73   : > { %1034 = vmatpush3.bf16.msra.mxu0 %v1031_v5 }
  0x74   : > { %1036 = vmatprep.subr.bf16.mxu0 %v1035_v8 }
  0x77   : > { %1038 = vmatpush3.bf16.msra.mxu0 %v1035_v8 }
  0x78   : > { %1040 = vmatprep.subr.bf16.mxu0 %v1039_v11 }
  0x7b   : > { %1042 = vmatpush3.bf16.msra.mxu0 %v1039_v11 }
 0x12c   : > { %v886_v46 = vpop.f32.mrb[0].mxu0 }
 0x12d   : > { %v416_v47 = vadd.f32 %v886_v46, %v815_v45  ;;  %v410_v48 = vpop.f32.mrb[1].mxu0 }
 0x12e   : > { %v411_v49 = vadd.f32 %v815_v45, %v410_v48 }
 0x130   : > { %1108 = vtanh.f32 %v411_v49  ;;  %v889_v50 = vpop.f32.mrb[2].mxu0 }
 0x131   : > { %1110 = vtanh.f32 %v416_v47  ;;  %v426_v51 = vadd.f32 %v889_v50, %v815_v45  ;;  %v420_v52 = vpop.f32.mrb[3].mxu0 }
 0x132   : > { %v421_v53 = vadd.f32 %v815_v45, %v420_v52 }
 0x134   : > { %1112 = vtanh.f32 %v421_v53  ;;  %v892_v54 = vpop.f32.mrb[4].mxu0 }
 0x135   : > { %1114 = vtanh.f32 %v426_v51  ;;  %v436_v55 = vadd.f32 %v892_v54, %v815_v45  ;;  %v430_v56 = vpop.f32.mrb[5].mxu0 }
 0x136   : > { %v431_v57 = vadd.f32 %v815_v45, %v430_v56 }
 0x138   : > { %1116 = vtanh.f32 %v431_v57 }
 0x139   : > { %1118 = vtanh.f32 %v436_v55 }
 0x13a   : > { %v1109_v58 = vpop.eup %1108 }
 0x13b   : > { %v1111_v59 = vpop.eup %1110  ;;  %925 = vmatprep.mubr.f32.mxu1 %v1109_v58 }
 0x13c   : > { %926 = vmatmul.mubr.f32.vlgmr.msra.gmra.mrb[0].mxu1 %v1111_v59 }
 0x13e   : > { %v1113_v60 = vpop.eup %1112 }
 0x13f   : > { %v1115_v61 = vpop.eup %1114  ;;  %928 = vmatprep.mubr.f32.mxu1 %v1113_v60 }
 0x140   : > { %929 = vmatmul.mubr.f32.gmra.mrb[2].mxu1 %v1115_v61 }
 0x142   : > { %v1117_v62 = vpop.eup %1116 }
 0x143   : > { %v1119_v63 = vpop.eup %1118  ;;  %931 = vmatprep.mubr.f32.mxu1 %v1117_v62 }
 0x144   : > { %932 = vmatmul.mubr.f32.gmra.mrb[4].mxu1 %v1119_v63 }
 0x20f   : > { %v927_v13 = vpop.f32.mrb[0].mxu1 }
 0x210   : > { %v540_v14 = vadd.f32 %v927_v13, %v822_v12  ;;  %v534_v15 = vpop.f32.mrb[1].mxu1 }
 0x211   : > { %v535_v16 = vadd.f32 %v822_v12, %v534_v15 }
 0x213   : > { %1120 = vtanh.f32 %v535_v16  ;;  %v930_v17 = vpop.f32.mrb[2].mxu1 }
 0x214   : > { %1122 = vtanh.f32 %v540_v14  ;;  %v550_v18 = vadd.f32 %v930_v17, %v822_v12  ;;  %v544_v19 = vpop.f32.mrb[3].mxu1 }
 0x215   : > { %v545_v20 = vadd.f32 %v822_v12, %v544_v19 }
 0x217   : > { %1124 = vtanh.f32 %v545_v20  ;;  %v933_v21 = vpop.f32.mrb[4].mxu1 }
 0x218   : > { %1126 = vtanh.f32 %v550_v18  ;;  %v560_v22 = vadd.f32 %v933_v21, %v822_v12  ;;  %v554_v23 = vpop.f32.mrb[5].mxu1 }
 0x219   : > { %v555_v24 = vadd.f32 %v822_v12, %v554_v23 }
 0x21b   : > { %1128 = vtanh.f32 %v555_v24 }
 0x21c   : > { %1130 = vtanh.f32 %v560_v22 }
 0x21d   : > { %v1121_v25 = vpop.eup %1120 }
 0x21e   : > { %v1123_v26 = vpop.eup %1122  ;;  %966 = vmatprep.mubr.f32.mxu0 %v1121_v25 }
 0x21f   : > { %967 = vmatmul.mubr.f32.vlgmr.msra.gmra.mrb[6].mxu0 %v1123_v26 }
 0x221   : > { %v1125_v27 = vpop.eup %1124 }
 0x222   : > { %v1127_v28 = vpop.eup %1126  ;;  %969 = vmatprep.mubr.f32.mxu0 %v1125_v27 }
 0x223   : > { %970 = vmatmul.mubr.f32.gmra.mrb[8].mxu0 %v1127_v28 }
 0x225   : > { %v1129_v29 = vpop.eup %1128 }
 0x226   : > { %v1131_v30 = vpop.eup %1130  ;;  %972 = vmatprep.mubr.f32.mxu0 %v1129_v29 }
 0x227   : > { %973 = vmatmul.mubr.f32.gmra.mrb[10].mxu0 %v1131_v30 }
 0x2f2   : > { %v968_v32 = vpop.f32.mrb[6].mxu0 }
 0x2f3   : > { %v664_v33 = vadd.f32 %v968_v32, %v823_v31  ;;  %v658_v34 = vpop.f32.mrb[7].mxu0 }
 0x2f4   : > { %v659_v35 = vadd.f32 %v823_v31, %v658_v34 }
 0x2f5   : > { %1132 = vtanh.f32 %v664_v33 }
 0x2f6   : > { %1134 = vtanh.f32 %v659_v35  ;;  %v971_v37 = vpop.f32.mrb[8].mxu0 }
 0x2f7   : > { %v674_v38 = vadd.f32 %v971_v37, %v823_v31  ;;  %v668_v39 = vpop.f32.mrb[9].mxu0 }
 0x2f8   : > { %v669_v40 = vadd.f32 %v823_v31, %v668_v39 }
 0x2f9   : > { %1136 = vtanh.f32 %v674_v38 }
 0x2fa   : > { %1138 = vtanh.f32 %v669_v40  ;;  %v974_v42 = vpop.f32.mrb[10].mxu0 }
 0x2fb   : > { %v684_v43 = vadd.f32 %v974_v42, %v823_v31  ;;  %v678_v44 = vpop.f32.mrb[11].mxu0 }
 0x2fc   : > { %v679_v45 = vadd.f32 %v823_v31, %v678_v44 }
 0x2fd   : > { %1140 = vtanh.f32 %v684_v43 }
 0x2fe   : > { %1142 = vtanh.f32 %v679_v45 }
 0x2ff   : > { %v1133_v46 = vpop.eup %1132 }
 0x300   : > { %v1135_v47 = vpop.eup %1134  ;;  %v697_v48 = vsel %vm689_vm1, %v1133_v46, %v664_v33 }
 0x301   : > { %703 = vst [vmem:[%s302_s16 + $0x8] sm:$0xff] %v697_v48  ;;  %v696_v49 = vsel %vm689_vm1, %v1135_v47, %v659_v35 }
 0x302   : > { %702 = vst [vmem:[%s302_s16] sm:$0xff] %v696_v49 }
 0x303   : > { %v1137_v50 = vpop.eup %1136 }
 0x304   : > { %v1139_v51 = vpop.eup %1138  ;;  %v699_v52 = vsel %vm689_vm1, %v1137_v50, %v674_v38 }
 0x305   : > { %705 = vst [vmem:[%s302_s16 + $0x18] sm:$0xff] %v699_v52  ;;  %v698_v53 = vsel %vm689_vm1, %v1139_v51, %v669_v40 }
 0x306   : > { %704 = vst [vmem:[%s302_s16 + $0x10] sm:$0xff] %v698_v53 }
 0x307   : > { %v1141_v54 = vpop.eup %1140 }
 0x308   : > { %v1143_v55 = vpop.eup %1142  ;;  %v701_v56 = vsel %vm689_vm1, %v1141_v54, %v684_v43 }
 0x309   : > { %707 = vst [vmem:[%s302_s16 + $0x28] sm:$0xff] %v701_v56  ;;  %v700_v57 = vsel %vm689_vm1, %v1143_v55, %v679_v45 }
 0x30a   : > { %706 = vst [vmem:[%s302_s16 + $0x20] sm:$0xff] %v700_v57 }
 0x30b   : > { %1213 = shalt.err (!%p1210_p11)
}
 0x30c   : > { %s1214_s8 = scalar_lea.hbm %s1519_s20, 768  ;;  %s1218_s10 = scalar_lea.hbm %s1573_s7, 1536 }
 0x30d   : > { %p1215_p13 = scmp.ne.s32.totalorder %s1519_s20, %s1214_s8  ;;  %p1219_p6 = scmp.lt.u32.totalorder %s1519_s20, %s1573_s7 }
 0x30e   : > { %p1220_p9 = scmp.lt.u32.totalorder %s1218_s10, %s1214_s8  ;;  %p1222_p12 = scmp.lt.u32.totalorder %s1214_s8, %s1519_s20 }
 0x30f   : > { %p1216_p5 = pnand %p1215_p13, %p1587_p1 }
 0x310   : > { %p1221_p10 = por %p1220_p9, %p1219_p6 }
 0x311   : > { %p1217_p0 = pneg %p1216_p5 }
 0x312   : > { %p1223_p2 = por %p1222_p12, %p1221_p10 }
 0x314   : > { %p1224_p3 = pnand %p1223_p2, %p1217_p0 }
 0x316   : > { %1227 = shalt.err (!%p1224_p3)
}
 0x317   : > { %s1277_s18 = smov 128   ;;  %s1278_s14 = smov 8  }
 0x318   : > { %1052 = dma.vmem_to_hbm [thread:$0]  (%p1587_p1), %s1514_s13, 768, %s1519_s20, %s1525_s28, %s1277_s18, %s1277_s18, %s1278_s14  }
 0x319 PF: > { %p1069_p4 = scmp.ge.s32.totalorder %s1270_s27, 2  ;;  %s737_s17 = sand.u32 1, %s1258_s24  }
 0x31a   : > { %p1588_p7 = scmp.ne.s32.totalorder %s1579_s12, 0  ;;  %s738_s21 = scalar_lea.sflag [#allocation4], %s737_s17 }
 0x31c   : > { %p1062_p8 = pnand %p1069_p4, %p1588_p7 }
 0x31e   : > { %1253 = dma.done.wait (!%p1062_p8), %s738_s21, 768  }
 0x31f   : > { %1255 = vsyncadd (!%p1062_p8), %s738_s21, 4294966528  ;;  %s1589_s22 = sld [smem:[#allocation11_spill]]  ;;  %p19_p11 = scmp.ge.s32.totalorder %s1344_s30, 4  }
 0x320   : > { %s1590_s24 = smov %s1262_s25  ;;  %s1591_s25 = smov %s1266_s26 }
 0x321   : > { %s1593_s27 = smov %s1344_s30  ;;  %21 = sbr.rel (!%p19_p11) target bundleno = 5 (0x5), region = 92 }
 0x325   : > { %s1592_s26 = smov %s1589_s22 }
 0x328   :  { %743 = vsyncpa [#allocation3], 1 }
 0x329   :  { %745 = vsyncpa [#allocation3 + $0x1], 1 }
 0x32a   :  { %746 = vsyncpa [#allocation6], 1 }
 0x32b   :  { %747 = vsyncpa [#allocation4], 1 }
 0x32c   :  { %749 = vsyncpa [#allocation4 + $0x1], 1 }

</bundles_post_ra>
